<compile_context>
chip_gen: v5e
topology: v5e:2x2
jax: 0.10.0
libtpu: 0.0.40
codegen_flags: <defaults>
</compile_context>

<pallas_src>
import jax
import jax.numpy as jnp
from jax.experimental import pallas as pl
from jax.experimental.pallas import tpu as pltpu


def make_s6_kernel(d_model, state_size, compute_dtype):
    def s6_kernel(x_ref, w_ref, b_ref, y_ref):
        x = x_ref[...]                                          # (tm, D), input dtype

        # One fused projection: [delta_pre | B | C] = x @ [W1^T | W2^T | W3^T] + b
        proj = jnp.dot(x.astype(compute_dtype), w_ref[...],
                       preferred_element_type=jnp.float32)      # (tm, D+2N), f32 acc
        proj = proj + b_ref[...]

        delta_pre = proj[:, :d_model]                           # (tm, D)
        Bp = proj[:, d_model:d_model + state_size]              # (tm, N)
        Cp = proj[:, d_model + state_size:]                     # (tm, N)

        # softplus (torch default beta=1, threshold=20), computed in f32 on VPU/EUP
        delta = jnp.where(delta_pre > 20.0, delta_pre,
                          jnp.log1p(jnp.exp(jnp.minimum(delta_pre, 20.0))))

        # y = x * delta * sum_n(B * C)    (exact because h0 == 0 in the module)
        s = jnp.sum(Bp * Cp, axis=-1, keepdims=True)            # (tm, 1)
        y = x.astype(jnp.float32) * delta * s
        y_ref[...] = y.astype(y_ref.dtype)
    return s6_kernel


def prepare_params(params, matmul_dtype=jnp.float32):
    """Pre-transpose + concatenate the three Linear layers ONCE (outside the kernel)."""
    D = params["W1"].shape[0]
    N = params["W2"].shape[0]
    Wcat = jnp.concatenate([params["W1"].T, params["W2"].T, params["W3"].T], axis=1)  # (D, D+2N)
    bcat = jnp.concatenate([params["b1"], params["b2"], params["b3"]]).reshape(1, D + 2 * N)
    # NOTE: A never contributes to the forward output (it only feeds the dead dA term).
    return {"Wcat": Wcat.astype(matmul_dtype),
            "bcat": bcat.astype(jnp.float32),
            "d_model": D, "state_size": N}


def _choose_tile_m(M, D, N, x_itemsize, w_itemsize, out_itemsize,
                   row_tile, vmem_budget_bytes):
    """Largest row tile (multiple of 8) whose working set fits the VMEM budget."""
    fixed = 2 * D * (D + 2 * N) * w_itemsize + 2 * (D + 2 * N) * 4   # weights + bias
    per_row = (2 * D * x_itemsize          # x tile, double buffered
               + 2 * D * out_itemsize      # y tile, double buffered
               + 4 * (D + 2 * N)           # proj temporary (f32)
               + 4 * D)                    # delta temporary (f32)
    avail = max(vmem_budget_bytes - fixed, 8 * per_row)
    tile = min(row_tile, max(8, avail // per_row))
    tile = max(8, (tile // 8) * 8)
    tile = min(tile, ((M + 7) // 8) * 8)
    return int(tile)


def s6_forward(x, prepped, *, row_tile=512, vmem_budget_bytes=12 * 1024 * 1024):
    D = prepped["d_model"]
    N = prepped["state_size"]
    Wcat = prepped["Wcat"]
    bcat = prepped["bcat"]
    Bsz, L, Dx = x.shape
    assert Dx == D

    M = Bsz * L
    xm = x.reshape(M, D)

    tile_m = _choose_tile_m(M, D, N,
                            x_itemsize=xm.dtype.itemsize,
                            w_itemsize=Wcat.dtype.itemsize,
                            out_itemsize=x.dtype.itemsize,
                            row_tile=row_tile,
                            vmem_budget_bytes=vmem_budget_bytes)
    Mp = ((M + tile_m - 1) // tile_m) * tile_m
    if Mp != M:
        xm = jnp.pad(xm, ((0, Mp - M), (0, 0)))

    kernel = make_s6_kernel(D, N, Wcat.dtype)
    y = pl.pallas_call(
        kernel,
        out_shape=jax.ShapeDtypeStruct((Mp, D), x.dtype),
        grid_spec=pltpu.PrefetchScalarGridSpec(
            num_scalar_prefetch=0,
            grid=(Mp // tile_m,),
            in_specs=[
                pl.BlockSpec((tile_m, D), lambda i: (i, 0)),        # x row tile
                pl.BlockSpec((D, D + 2 * N), lambda i: (0, 0)),     # fused weights (constant)
                pl.BlockSpec((1, D + 2 * N), lambda i: (0, 0)),     # fused bias (constant)
            ],
            out_specs=pl.BlockSpec((tile_m, D), lambda i: (i, 0)),
        ),
        compiler_params=pltpu.CompilerParams(
            dimension_semantics=("parallel",),
        ),
    )(xm, Wcat, bcat)

    return y[:M].reshape(Bsz, L, D)


def init_params(key, d_model, state_size):
    k1, k2, k3, k4, k5, k6, ka = jax.random.split(key, 7)
    # nn.Linear default init: U(-1/sqrt(fan_in), 1/sqrt(fan_in))
    bnd = 1.0 / jnp.sqrt(d_model)
    W1 = jax.random.uniform(k1, (d_model, d_model), jnp.float32, -bnd, bnd)
    b1 = jax.random.uniform(k2, (d_model,), jnp.float32, -bnd, bnd)
    W2 = jax.random.uniform(k3, (state_size, d_model), jnp.float32, -bnd, bnd)
    b2 = jax.random.uniform(k4, (state_size,), jnp.float32, -bnd, bnd)
    W3 = jax.random.uniform(k5, (state_size, d_model), jnp.float32, -bnd, bnd)
    b3 = jax.random.uniform(k6, (state_size,), jnp.float32, -bnd, bnd)
    # A: xavier_uniform_ on (d_model, state_size) — unused by the forward output.
    a_bnd = jnp.sqrt(6.0 / (d_model + state_size))
    A = jax.random.uniform(ka, (d_model, state_size), jnp.float32, -a_bnd, a_bnd)
    return {"W1": W1, "b1": b1, "W2": W2, "b2": b2, "W3": W3, "b3": b3, "A": A}


def s6_reference(x, params):
    # Plain-JAX transcription of the full PyTorch forward (including the dead dA term).
    delta_pre = x @ params["W1"].T + params["b1"]
    delta = jnp.where(delta_pre > 20.0, delta_pre,
                      jnp.log1p(jnp.exp(jnp.minimum(delta_pre, 20.0))))
    Bp = x @ params["W2"].T + params["b2"]
    Cp = x @ params["W3"].T + params["b3"]
    dB = jnp.einsum("bld,bln->bldn", delta, Bp)
    dA = jnp.exp(jnp.einsum("bld,dn->bldn", delta, params["A"]))
    h = dA * jnp.zeros_like(dA) + x[..., None] * dB
    return jnp.einsum("bln,bldn->bld", Cp, h)


if __name__ == "__main__":
    batch, seq_len, d_model, state_size = 2, 8, 32, 16
    key = jax.random.PRNGKey(0)
    kx, kp = jax.random.split(key)
    x = jax.random.normal(kx, (batch, seq_len, d_model), jnp.float32)
    params = init_params(kp, d_model, state_size)

    y_ref = s6_reference(x, params)

    # f32 matmul path (near-exact against the reference).
    prep_f32 = prepare_params(params, jnp.float32)
    y = s6_forward(x, prep_f32)
    jax.block_until_ready(y)
    assert y.shape == (batch, seq_len, d_model)
    assert jnp.allclose(y, y_ref, atol=1e-4, rtol=1e-4)

    # bf16 matmul operands (v6e / v7x MXU path); x, accumulation + epilogue stay f32.
    prep_bf16 = prepare_params(params, jnp.bfloat16)
    y16 = s6_forward(x, prep_bf16)
    jax.block_until_ready(y16)
    rel_err = jnp.linalg.norm(y16 - y_ref) / (jnp.linalg.norm(y_ref) + 1e-8)
    assert rel_err < 5e-2

    print("KERNEL_OK")
</pallas_src>

<mosaic_0001>
module attributes {stable_mosaic.version = 11 : i64} {
  func.func @s6_kernel(%arg0: i32, %arg1: memref<16x32xf32, #tpu.memory_space<vmem>>, %arg2: memref<32x64xf32, #tpu.memory_space<vmem>>, %arg3: memref<1x64xf32, #tpu.memory_space<vmem>>, %arg4: memref<16x32xf32, #tpu.memory_space<vmem>>) attributes {dimension_semantics = [#tpu.dimension_semantics<parallel>], iteration_bounds = array<i64: 1>, scalar_prefetch = 0 : i64, scratch_operands = 0 : i64, tpu.core_type = #tpu.core_type<tc>, window_params = [{transform_indices = @transform_0, window_bounds = array<i64: 16, 32>}, {pipeline_mode = #tpu.pipeline_mode<synchronous>, transform_indices = @transform_1, window_bounds = array<i64: 32, 64>}, {pipeline_mode = #tpu.pipeline_mode<synchronous>, transform_indices = @transform_2, window_bounds = array<i64: 1, 64>}, {transform_indices = @transform_3, window_bounds = array<i64: 16, 32>}]} {
    %c0 = arith.constant 0 : index
    %c0_0 = arith.constant 0 : index
    %0 = vector.load %arg1[%c0, %c0_0] : memref<16x32xf32, #tpu.memory_space<vmem>>, vector<16x32xf32>
    %c0_1 = arith.constant 0 : index
    %c0_2 = arith.constant 0 : index
    %1 = vector.load %arg2[%c0_1, %c0_2] : memref<32x64xf32, #tpu.memory_space<vmem>>, vector<32x64xf32>
    %cst = arith.constant dense<0.000000e+00> : vector<16x64xf32>
    %2 = tpu.matmul %0, %1, %cst {dimension_numbers = #tpu.dot_dimension_numbers<[1], [0], [0], [1], [0, 0, 1, 1], [], []>} : vector<16x32xf32>, vector<32x64xf32>, vector<16x64xf32> -> vector<16x64xf32>
    %c0_3 = arith.constant 0 : index
    %c0_4 = arith.constant 0 : index
    %3 = vector.load %arg3[%c0_3, %c0_4] : memref<1x64xf32, #tpu.memory_space<vmem>>, vector<1x64xf32>
    %4 = vector.broadcast %3 : vector<1x64xf32> to vector<16x64xf32>
    %5 = arith.addf %2, %4 : vector<16x64xf32>
    %6 = vector.extract_strided_slice %5 {offsets = [0, 0], sizes = [16, 32], strides = [1, 1]} : vector<16x64xf32> to vector<16x32xf32>
    %7 = vector.extract_strided_slice %5 {offsets = [0, 32], sizes = [16, 16], strides = [1, 1]} : vector<16x64xf32> to vector<16x16xf32>
    %8 = vector.extract_strided_slice %5 {offsets = [0, 48], sizes = [16, 16], strides = [1, 1]} : vector<16x64xf32> to vector<16x16xf32>
    %cst_5 = arith.constant 2.000000e+01 : f32
    %9 = vector.broadcast %cst_5 : f32 to vector<16x32xf32>
    %10 = arith.cmpf ogt, %6, %9 : vector<16x32xf32>
    %cst_6 = arith.constant 2.000000e+01 : f32
    %11 = vector.broadcast %cst_6 : f32 to vector<16x32xf32>
    %12 = arith.minimumf %6, %11 : vector<16x32xf32>
    %13 = math.exp %12 : vector<16x32xf32>
    %14 = math.log1p %13 : vector<16x32xf32>
    %15 = arith.select %10, %6, %14 : vector<16x32xi1>, vector<16x32xf32>
    %16 = arith.mulf %7, %8 : vector<16x16xf32>
    %cst_7 = arith.constant dense<0.000000e+00> : vector<16xf32>
    %17 = vector.multi_reduction <add>, %16, %cst_7 [1] : vector<16x16xf32> to vector<16xf32>
    %18 = vector.shape_cast %17 : vector<16xf32> to vector<16x1xf32>
    %19 = arith.mulf %0, %15 : vector<16x32xf32>
    %20 = vector.broadcast %18 : vector<16x1xf32> to vector<16x32xf32>
    %21 = arith.mulf %19, %20 : vector<16x32xf32>
    %c0_8 = arith.constant 0 : index
    %c0_9 = arith.constant 0 : index
    %22 = vector.load %arg4[%c0_8, %c0_9] : memref<16x32xf32, #tpu.memory_space<vmem>>, vector<16x32xf32>
    tpu.vector_store %arg4[%c0_8, %c0_9], %21 {strides = array<i32>} : memref<16x32xf32, #tpu.memory_space<vmem>>, vector<16x32xf32>,
    return
  }
  func.func @transform_0(%arg0: i32) -> (i32, i32) {
    %c0_i32 = arith.constant 0 : i32
    %c0_i32_0 = arith.constant 0 : i32
    return %arg0, %c0_i32 : i32, i32
  }
  func.func @transform_1(%arg0: i32) -> (i32, i32) {
    %c0_i32 = arith.constant 0 : i32
    %c0_i32_0 = arith.constant 0 : i32
    %c0_i32_1 = arith.constant 0 : i32
    return %c0_i32, %c0_i32_0 : i32, i32
  }
  func.func @transform_2(%arg0: i32) -> (i32, i32) {
    %c0_i32 = arith.constant 0 : i32
    %c0_i32_0 = arith.constant 0 : i32
    %c0_i32_1 = arith.constant 0 : i32
    return %c0_i32, %c0_i32_0 : i32, i32
  }
  func.func @transform_3(%arg0: i32) -> (i32, i32) {
    %c0_i32 = arith.constant 0 : i32
    %c0_i32_0 = arith.constant 0 : i32
    return %arg0, %c0_i32 : i32, i32
  }
}

</mosaic_0001>

<bundles_post_ra>
// kernel: tpu_custom_call.1
= control target key start
LH: loop header
LB: loop body
LE: loop exit
PB: predicated region body
PF: predicated region fallthrough
CT: control target
= control target key end

     0   :  { %8 = vsyncpa [#allocation3], 0  ;;  %s322_s0 = inlined_call_operand.hbm [shape: f32[16,32], index: 0, kind: input, shape index: {}]   ;;  %s323_s1 = inlined_call_operand.hbm [shape: f32[32,64], index: 1, kind: input, shape index: {}]   ;;  %s324_s2 = inlined_call_operand.vmem [shape: f32[1,64], index: 2, kind: input, shape index: {}]   ;;  %s325_s3 = inlined_call_operand.hbm [shape: f32[16,32], index: 3, kind: output, shape index: {}]  }
   0x1   :  { %9 = vsyncpa [#allocation6], 0 }
   0x2   :  { %10 = vsyncpa [#allocation4], 0  ;;  %s15_s14 = sshll.u32 %s322_s0, 4  ;;  %s266_s15 = smov [#allocation2]   ;;  %s16_s14 = int_to_ptr.hbm [resolvable:$true] %s15_s14 }
   0x3   :  { %s17_s16 = sshll.u32 %s266_s15, 4  ;;  %s28_s19 = sshll.u32 %s323_s1, 4  ;;  %s18_s16 = int_to_ptr.vmem [resolvable:$true] %s17_s16  ;;  %s29_s19 = int_to_ptr.hbm [resolvable:$true] %s28_s19 }
   0x4   :  { %s267_s20 = smov 128   ;;  %s268_s21 = smov 8  }
   0x5   :  { %23 = dma.hbm_to_vmem [thread:$0]  %s16_s14, 256, %s18_s16, [#allocation3], %s267_s20, %s267_s20, %s268_s21  }
   0x6   :  { %s269_s22 = smov [#allocation5]  }
   0x7   :  { %s30_s23 = sshll.u32 %s269_s22, 4  ;;  %s31_s23 = int_to_ptr.vmem [resolvable:$true] %s30_s23 }
   0x8   :  { %36 = dma.hbm_to_vmem [thread:$0]  %s29_s19, 512, %s31_s23, [#allocation6], %s267_s20, %s267_s20, %s268_s21  }
   0x9   :  { %260 = dma.done.wait [#allocation3], 256  }
   0xa   :  { %261 = vsyncadd [#allocation3], 4294967040 }
   0xb   :  { %262 = dma.done.wait [#allocation6], 512  }
   0xc   :  { %263 = vsyncadd [#allocation6], 4294966784  ;;  %v52_v0 = vld [vmem:[#allocation5 + $0x18] sm:$0xff]  ;;  %v51_v1 = vld [vmem:[#allocation5 + $0x10] sm:$0xff]  ;;  %vm57_vm0 = vcmask 261120   ;;  %s270_s24 = smov 112  }
   0xd   :  { %76 = vmatpush.msra.mxu0 %v52_v0  ;;  %168 = vmatpush.msra.mxu1 %v52_v0  ;;  %v50_v2 = vld [vmem:[#allocation5 + $0x8] sm:$0xff]  ;;  %v49_v3 = vld [vmem:[#allocation5] sm:$0xff]  ;;  %v47_v4 = vld [vmem:[#allocation2] sm:$0xff]  ;;  %s271_s25 = smov 96   ;;  %vm133_vm1 = vcmask 130048   ;;  %s152_s29 = sshll.u32 %s325_s3, 4  ;;  %s153_s29 = int_to_ptr.hbm [resolvable:$true] %s152_s29 }
   0xe   :  { %v305_v5 = vld [vmem:[#allocation2 + $0x8] sm:$0xff]  ;;  %v179_v6 = vld [vmem:[%s324_s2] ss:$0 sm:$0xff]  ;;  %s272_s2 = smov [#allocation7]  }
   0xf   :  { %77 = vmatpush.msra.mxu0 %v51_v1  ;;  %169 = vmatpush.msra.mxu1 %v51_v1  ;;  %s150_s26 = sshll.u32 %s272_s2, 4  ;;  %s151_s26 = int_to_ptr.vmem [resolvable:$true] %s150_s26 }
  0x11   :  { %78 = vmatpush.msra.mxu0 %v50_v2  ;;  %170 = vmatpush.msra.mxu1 %v50_v2 }
  0x13   :  { %79 = vmatpush.msra.mxu0 %v49_v3  ;;  %171 = vmatpush.msra.mxu1 %v49_v3 }
  0x14   :  { %166 = vmatmul.msk.f32.vlgmr.msra.gmra.mxu0 %vm57_vm0, %v47_v4  ;;  %167 = vmatmul.msk.f32.vlgmr.msra.gmra.mxu1 %vm57_vm0, %v305_v5 }
  0x91   :  { %v81_v7 = vpop.f32.mrf.mxu0  ;;  %v84_v9 = vpop.f32.mrf.mxu1 }
  0x92   :  { %v82_v8 = vadd.f32 %v179_v6, %v81_v7  ;;  %v85_v10 = vadd.f32 %v179_v6, %v84_v9 }
  0x94   :  { %117 = vrot.lane.b32.xlu0 %v82_v8, %s270_s24  ;;  %v89_v19 = vmin.f32 %v82_v8, 20.0  ;;  %v90_v21 = vmin.f32 %v85_v10, 20.0  ;;  %vm87_vm3 = vcmp.gt.f32.partialorder %v82_v8, 20.0  ;;  %vm88_vm5 = vcmp.gt.f32.partialorder %v85_v10, 20.0 }
  0x96   :  { %v91_v20 = vmul.f32 1.442695, %v89_v19  ;;  %v93_v22 = vmul.f32 1.442695, %v90_v21 }
  0x98   :  { %180 = vpow2.f32 %v91_v20 }
  0x99   :  { %182 = vpow2.f32 %v93_v22 }
  0x9c   :  { %119 = vrot.lane.b32.xlu0 %v85_v10, %s270_s24 }
  0x9e   :  { %v181_v23 = vpop.eup %180 }
  0x9f   :  { %v95_v24 = vadd.f32 1.0, %v181_v23  ;;  %v183_v25 = vpop.eup %182  ;;  %v98_v26 = vmul.f32 -0.5, %v181_v23  ;;  %v101_v30 = vand.u32 2147483647, %v181_v23 }
  0xa0   :  { %v104_v27 = vadd.f32 1.0, %v183_v25  ;;  %v107_v32 = vmul.f32 -0.5, %v183_v25  ;;  %v110_v37 = vand.u32 2147483647, %v183_v25 }
  0xa1   :  { %184 = vlog2.f32 %v95_v24  ;;  %v99_v29 = vadd.f32 1.0, %v98_v26  ;;  %vm102_vm2 = vcmp.lt.f32.partialorder %v101_v30, 0.0004427343 }
  0xa2   :  { %186 = vlog2.f32 %v104_v27  ;;  %v108_v35 = vadd.f32 1.0, %v107_v32  ;;  %vm111_vm4 = vcmp.lt.f32.partialorder %v110_v37, 0.0004427343 }
  0xa3   :  { %v100_v33 = vmul.f32 %v181_v23, %v99_v29 }
  0xa4   :  { %v109_v40 = vmul.f32 %v183_v25, %v108_v35 }
  0xa7   :  { %v185_v28 = vpop.eup %184 }
  0xa8   :  { %v97_v31 = vmul.f32 0.6931472, %v185_v28  ;;  %v187_v36 = vpop.eup %186 }
  0xa9   :  { %v106_v39 = vmul.f32 0.6931472, %v187_v36 }
  0xaa   :  { %v103_v34 = vsel %vm102_vm2, %v100_v33, %v97_v31 }
  0xab   :  { %v113_v38 = vsel %vm87_vm3, %v82_v8, %v103_v34  ;;  %v112_v44 = vsel %vm111_vm4, %v109_v40, %v106_v39 }
  0xac   :  { %v140_v41 = vmul.f32 %v113_v38, %v47_v4  ;;  %v114_v45 = vsel %vm88_vm5, %v85_v10, %v112_v44 }
  0xad   :  { %v141_v46 = vmul.f32 %v114_v45, %v305_v5 }
 0x106   :  { %v118_v11 = vpop.permute.xlu0 %117 }
 0x107   :  { %v123_v12 = vmul.f32 %v118_v11, %v82_v8 }
 0x109   :  { %127 = vrot.lane.b32.xlu1 %v123_v12, %s271_s25 }
 0x10e   :  { %v120_v13 = vpop.permute.xlu0 %119 }
 0x10f   :  { %v124_v14 = vmul.f32 %v120_v13, %v85_v10 }
 0x111   :  { %129 = vrot.lane.b32.xlu1 %v124_v14, %s271_s25 }
 0x17b   :  { %v128_v15 = vpop.permute.xlu1 %127 }
 0x17c   :  { %v134_v16 = vsel %vm133_vm1, %v128_v15, 0.0 }
 0x17d   :  { %135 = vadd.xlane.f32.xlu2 %v134_v16 }
 0x183   :  { %v130_v17 = vpop.permute.xlu1 %129 }
 0x184   :  { %v137_v18 = vsel %vm133_vm1, %v130_v17, 0.0 }
 0x185   :  { %138 = vadd.xlane.f32.xlu2 %v137_v18 }
 0x1f0   :  { %v136_v42 = vpop.xlane.xlu2 %135 }
 0x1f1   :  { %v142_v43 = vmul.f32 %v140_v41, %v136_v42 }
 0x1f3   :  { %144 = vst.msk [vmem:[#allocation7] sm:$0xff] %vm57_vm0, %v142_v43 }
 0x1f8   :  { %v139_v47 = vpop.xlane.xlu2 %138 }
 0x1f9   :  { %v143_v48 = vmul.f32 %v141_v46, %v139_v47 }
 0x1fb   :  { %145 = vst.msk [vmem:[#allocation7 + $0x8] sm:$0xff] %vm57_vm0, %v143_v48 }
 0x1fc   :  { %158 = dma.vmem_to_hbm [thread:$0]  %s151_s26, 256, %s153_s29, [#allocation4], %s267_s20, %s267_s20, %s268_s21  }
 0x1fd   :  { %264 = dma.done.wait [#allocation4], 256  }
 0x1fe   :  { %265 = vsyncadd [#allocation4], 4294967040 }
 0x1ff   :  { %163 = vsyncpa [#allocation3], 1 }
 0x200   :  { %164 = vsyncpa [#allocation6], 1 }
 0x201   :  { %165 = vsyncpa [#allocation4], 1 }

</bundles_post_ra>
